<compile_context>
chip_gen: v5e
topology: v5e:2x2
jax: 0.10.0
libtpu: 0.0.40
codegen_flags: <defaults>
</compile_context>

<pallas_src>
import functools
import math

import jax
import jax.numpy as jnp
from jax.experimental import pallas as pl
from jax.experimental.pallas import tpu as pltpu


def _reg_loss_kernel(thresh_ref, col_ref, wval_ref, winv_ref, pred_ref,
                     anc_ref, out_ref, *, D, C, tile_R, sym_roll):
    """One (batch b, row-tile t) grid step.

    thresh_ref: (B, 1)          i32 SMEM  lengths[b] * A * D (full array)
    col_ref:    (1, C)          i32 VMEM  lane index 0..C-1
    wval_ref:   (1, C)          f32 VMEM  1.0  on anchor-marker lanes, else 0
    winv_ref:   (1, C)          f32 VMEM  1e15 on anchor-marker lanes, else 0
    pred_ref:   (1, 1, C)       f32 VMEM  predictions[b] tiled along lanes
    anc_ref:    (1, tile_R, C)  any VMEM  anchors[b, t*tile_R:(t+1)*tile_R, :]
    out_ref:    (1, 1, C)       f32 VMEM  lane partial sums for this (b, t)
    """
    b = pl.program_id(0)
    t = pl.program_id(1)

    # Native-dtype DMA, in-kernel upcast (single HBM read of the big tensor).
    x = anc_ref[0].astype(jnp.float32)              # (tile_R, C)
    diff = x - pred_ref[0]                          # broadcast (1, C)
    sq = diff * diff

    # Per-anchor squared distance: one anchor occupies D consecutive lanes
    # (C % D == 0, so groups never straddle rows).  The group total is formed
    # with D-1 lane rotations and lands on a fixed "marker" lane per group.
    # tile_R always divides R exactly, so there are never OOB-garbage rows and
    # every lane of g is a finite sum of squares -> sqrt needs no select.
    # (Do NOT reintroduce a multiply-mask before this point; see review notes.)
    g = sq
    if sym_roll:
        # Symmetric +/-m rotations on the XLU rotate slot; the total lands on
        # the middle lane of each D-group regardless of rotate direction.
        for m in range(1, (D - 1) // 2 + 1):
            g = g + pltpu.roll(sq, m, axis=1) + pltpu.roll(sq, C - m, axis=1)
    else:
        # np.roll convention: total lands on the last lane of each D-group.
        for k in range(1, D):
            g = g + jnp.roll(sq, k, axis=1)
    dist = jnp.sqrt(g)

    # Length mask as ONE broadcast compare against a per-row scalar threshold:
    # marker lane c of row r is valid  <=>  c < lengths[b]*A*D - row_start.
    row = jax.lax.broadcasted_iota(jnp.int32, (tile_R, 1), 0)
    rem = (thresh_ref[b, 0] - t * (tile_R * C)) - row * C        # (tile_R, 1)
    w = jnp.where(col_ref[...] < rem, wval_ref[...], winv_ref[...])

    out_ref[...] = jnp.sum(dist * w, axis=0, keepdims=True).reshape(1, 1, C)


def _pick_tile_r(R, sub, max_rows):
    """Largest divisor of R <= max_rows, preferring sublane-aligned ones."""
    if R <= max_rows:
        return R
    for step in (sub, 8, 1):
        best = 0
        for d in range(step, max_rows + 1, step):
            if R % d == 0:
                best = d
        if best:
            return best
    return R


def baseline_reg_loss(predictions, anchors, lengths, *,
                      max_lanes=4096, max_rows=None):
    """predictions: (B, D) f32, anchors: (B, L, A, D) any float, lengths: (B,).

    Requires max(lengths) == L (same constraint as the PyTorch broadcasting).
    Returns a float32 scalar equal to BaselineRegLoss.forward(...).
    """
    B, L, A, D = anchors.shape
    LAD = L * A * D
    if LAD >= 2 ** 31:
        raise ValueError("per-batch flat size must fit int32 indexing")
    itemsize = jnp.dtype(anchors.dtype).itemsize

    # ---- generation-aware VMEM budget --------------------------------------
    try:
        vmem_cap = int(pltpu.get_tpu_info().vmem_capacity_bytes)
    except Exception:
        vmem_cap = None
    if vmem_cap is not None and vmem_cap <= 64 * 1024 * 1024:   # v7x-class TC
        block_budget, vmem_limit = 3 << 20, 44 << 20
    elif vmem_cap is not None:                                  # v5e / v6e
        block_budget, vmem_limit = 6 << 20, 64 << 20
    else:                                                       # unknown chip
        block_budget, vmem_limit = 4 << 20, 32 << 20

    # ---- lane-dense (R, C) factorization of the flat per-batch axis --------
    base = (D * 128) // math.gcd(D, 128)          # lcm(D, 128)
    lane_cap = max(D, min(LAD, max_lanes))
    if LAD % base == 0 and base <= lane_cap:
        C = base
        while C * 2 <= lane_cap and LAD % (C * 2) == 0:
            C *= 2
    else:
        # Largest divisor of LAD that is a multiple of D and <= lane_cap.
        # The block keeps the full lane axis, so C need not be 128-aligned,
        # and we never emit a single (R=1, C=LAD) monster row for large LAD.
        C = D
        for c in range(D, lane_cap + 1, D):
            if LAD % c == 0:
                C = c
    R = LAD // C

    sym_roll = (C % 128 == 0) and (D % 2 == 1)    # XLU-rotate path
    marker_pos = (D - 1) // 2 if sym_roll else D - 1

    # ---- rows per block: exact divisor of R, sublane-aligned, budget-capped
    sub = max(8, (8 * 4) // itemsize)             # 8 f32 / 16 bf16 / 32 int8
    if max_rows is None:
        max_rows = max(1, block_budget // (C * 4))   # budget in f32 work-tiles
    tile_R = _pick_tile_r(R, sub, max_rows)
    num_row_tiles = R // tile_R

    # ---- tiny precomputed constants (keep per-step VPU work minimal) -------
    preds_f32 = predictions.astype(jnp.float32)
    pred_tiled = jnp.tile(preds_f32, (1, C // D)).reshape(B, 1, C)
    lane = jnp.arange(C, dtype=jnp.int32).reshape(1, C)
    marker = (lane % D) == marker_pos
    wval = jnp.where(marker, jnp.float32(1.0), jnp.float32(0.0))
    winv = jnp.where(marker, jnp.float32(1.0e15), jnp.float32(0.0))
    thresh = (lengths.astype(jnp.int32) * (A * D)).reshape(B, 1)

    anchors_view = anchors.reshape(B, R, C)       # pure view, native dtype

    kernel = functools.partial(_reg_loss_kernel, D=D, C=C, tile_R=tile_R,
                               sym_roll=sym_roll)

    partials = pl.pallas_call(
        kernel,
        out_shape=jax.ShapeDtypeStruct((B * num_row_tiles, 1, C), jnp.float32),
        grid=(B, num_row_tiles),
        in_specs=[
            pl.BlockSpec(memory_space=pltpu.MemorySpace.SMEM),        # thresh
            pl.BlockSpec((1, C), lambda b, t: (0, 0)),                # lane idx
            pl.BlockSpec((1, C), lambda b, t: (0, 0)),                # wval
            pl.BlockSpec((1, C), lambda b, t: (0, 0)),                # winv
            pl.BlockSpec((1, 1, C), lambda b, t: (b, 0, 0)),          # pred
            pl.BlockSpec((1, tile_R, C), lambda b, t: (b, t, 0)),     # anchors
        ],
        out_specs=pl.BlockSpec(
            (1, 1, C), lambda b, t: (b * num_row_tiles + t, 0, 0)),
        compiler_params=pltpu.CompilerParams(
            dimension_semantics=("parallel", "parallel"),
            vmem_limit_bytes=vmem_limit),
    )(thresh, lane, wval, winv, pred_tiled, anchors_view)

    return jnp.sum(partials) / jnp.float32(B * L * A)


def _reference_loss(predictions, anchors, lengths):
    """Plain-JAX mirror of the PyTorch forward, for verification."""
    B, L, A, D = anchors.shape
    mask = (jnp.arange(L)[None, :] < lengths[:, None]).astype(jnp.float32)
    mask = jnp.where(mask == 0, 1.0e15, mask)[:, :, None]               # (B, L, 1)
    dist = jnp.linalg.norm(
        predictions[:, None, None, :].astype(jnp.float32)
        - anchors.astype(jnp.float32), axis=3)                          # (B, L, A)
    return jnp.mean(dist * mask)


if __name__ == "__main__":
    root = jax.random.PRNGKey(0)

    def check(B, L, A, D, lengths_list, dtype=jnp.float32, **kw):
        k1, k2 = jax.random.split(
            jax.random.fold_in(root, 7919 * B + 31 * L + D))
        preds = jax.random.normal(k1, (B, D), dtype=jnp.float32)
        anchors = jax.random.normal(k2, (B, L, A, D),
                                    dtype=jnp.float32).astype(dtype)
        lengths = jnp.array(lengths_list, dtype=jnp.int32)  # max(lengths) == L
        loss = baseline_reg_loss(preds, anchors, lengths, **kw)
        jax.block_until_ready(loss)
        ref = _reference_loss(preds, anchors, lengths)
        assert jnp.allclose(loss, ref, rtol=2e-3), (B, L, A, D, dtype, loss, ref)
        return loss

    # Primary small case (single tile, lane-dense C = 384).
    check(2, 16, 8, 3, [16, 10])
    # Multi row-tile grid (forced small tiles): per-(b, t) partial outputs and
    # a length boundary that falls inside a tile.
    check(2, 512, 8, 3, [512, 300], max_lanes=384, max_rows=8)
    # Native bf16 anchors: in-kernel upcast, 16-row sublane-aligned tiles.
    check(2, 512, 8, 3, [512, 300], dtype=jnp.bfloat16,
          max_lanes=384, max_rows=16)
    # Fallback lane factorization (L*A*D not a multiple of lcm(D, 128)).
    check(2, 7, 5, 3, [7, 4])

    print("KERNEL_OK")
</pallas_src>

<mosaic_0001>
module attributes {stable_mosaic.version = 11 : i64} {
  func.func @_reg_loss_kernel(%arg0: i32, %arg1: i32, %arg2: memref<2x1xi32, #tpu.memory_space<smem>>, %arg3: memref<1x384xi32, #tpu.memory_space<vmem>>, %arg4: memref<1x384xf32, #tpu.memory_space<vmem>>, %arg5: memref<1x384xf32, #tpu.memory_space<vmem>>, %arg6: memref<1x1x384xf32, #tpu.memory_space<vmem>>, %arg7: memref<1x1x384xf32, #tpu.memory_space<vmem>>, %arg8: memref<1x1x384xf32, #tpu.memory_space<vmem>>) attributes {dimension_semantics = [#tpu.dimension_semantics<parallel>, #tpu.dimension_semantics<parallel>], iteration_bounds = array<i64: 2, 1>, scalar_prefetch = 0 : i64, scratch_operands = 0 : i64, tpu.core_type = #tpu.core_type<tc>, window_params = [{transform_indices = @transform_0, window_bounds = array<i64: 2, 1>}, {pipeline_mode = #tpu.pipeline_mode<synchronous>, transform_indices = @transform_1, window_bounds = array<i64: 1, 384>}, {pipeline_mode = #tpu.pipeline_mode<synchronous>, transform_indices = @transform_2, window_bounds = array<i64: 1, 384>}, {pipeline_mode = #tpu.pipeline_mode<synchronous>, transform_indices = @transform_3, window_bounds = array<i64: 1, 384>}, {transform_indices = @transform_4, window_bounds = array<i64: 1, 1, 384>}, {transform_indices = @transform_5, window_bounds = array<i64: 1, 1, 384>}, {transform_indices = @transform_6, window_bounds = array<i64: 1, 1, 384>}]} {
    %c0 = arith.constant 0 : index
    %c0_0 = arith.constant 0 : index
    %c0_1 = arith.constant 0 : index
    %0 = vector.load %arg7[%c0, %c0_0, %c0_1] : memref<1x1x384xf32, #tpu.memory_space<vmem>>, vector<1x1x384xf32>
    %1 = vector.shape_cast %0 : vector<1x1x384xf32> to vector<1x384xf32>
    %c0_2 = arith.constant 0 : index
    %c0_3 = arith.constant 0 : index
    %c0_4 = arith.constant 0 : index
    %2 = vector.load %arg6[%c0_2, %c0_3, %c0_4] : memref<1x1x384xf32, #tpu.memory_space<vmem>>, vector<1x1x384xf32>
    %3 = vector.shape_cast %2 : vector<1x1x384xf32> to vector<1x384xf32>
    %4 = arith.subf %1, %3 : vector<1x384xf32>
    %5 = arith.mulf %4, %4 : vector<1x384xf32>
    %c1_i32 = arith.constant 1 : i32
    %6 = tpu.dynamic_rotate %5 by %c1_i32 dim 1 : vector<1x384xf32>, i32 -> vector<1x384xf32>
    %7 = arith.addf %5, %6 : vector<1x384xf32>
    %c383_i32 = arith.constant 383 : i32
    %8 = tpu.dynamic_rotate %5 by %c383_i32 dim 1 : vector<1x384xf32>, i32 -> vector<1x384xf32>
    %9 = arith.addf %7, %8 : vector<1x384xf32>
    %10 = math.sqrt %9 : vector<1x384xf32>
    %11 = tpu.iota {dimensions = array<i32: 0>} : vector<1x1xi32>
    %12 = arith.index_cast %arg0 : i32 to index
    %c0_5 = arith.constant 0 : index
    %13 = memref.load %arg2[%12, %c0_5] : memref<2x1xi32, #tpu.memory_space<smem>>
    %c384_i32 = arith.constant 384 : i32
    %14 = arith.muli %arg1, %c384_i32 : i32
    %15 = arith.subi %13, %14 : i32
    %c384_i32_6 = arith.constant 384 : i32
    %16 = vector.broadcast %c384_i32_6 : i32 to vector<1x1xi32>
    %17 = arith.muli %11, %16 : vector<1x1xi32>
    %18 = vector.broadcast %15 : i32 to vector<1x1xi32>
    %19 = arith.subi %18, %17 : vector<1x1xi32>
    %c0_7 = arith.constant 0 : index
    %c0_8 = arith.constant 0 : index
    %20 = vector.load %arg3[%c0_7, %c0_8] : memref<1x384xi32, #tpu.memory_space<vmem>>, vector<1x384xi32>
    %21 = vector.broadcast %19 : vector<1x1xi32> to vector<1x384xi32>
    %22 = arith.cmpi slt, %20, %21 : vector<1x384xi32>
    %c0_9 = arith.constant 0 : index
    %c0_10 = arith.constant 0 : index
    %23 = vector.load %arg4[%c0_9, %c0_10] : memref<1x384xf32, #tpu.memory_space<vmem>>, vector<1x384xf32>
    %c0_11 = arith.constant 0 : index
    %c0_12 = arith.constant 0 : index
    %24 = vector.load %arg5[%c0_11, %c0_12] : memref<1x384xf32, #tpu.memory_space<vmem>>, vector<1x384xf32>
    %25 = arith.select %22, %23, %24 : vector<1x384xi1>, vector<1x384xf32>
    %26 = arith.mulf %10, %25 : vector<1x384xf32>
    %cst = arith.constant dense<0.000000e+00> : vector<384xf32>
    %27 = vector.multi_reduction <add>, %26, %cst [0] : vector<1x384xf32> to vector<384xf32>
    %28 = vector.shape_cast %27 : vector<384xf32> to vector<1x384xf32>
    %29 = vector.shape_cast %28 : vector<1x384xf32> to vector<1x1x384xf32>
    %c0_13 = arith.constant 0 : index
    %c0_14 = arith.constant 0 : index
    %c0_15 = arith.constant 0 : index
    %30 = vector.load %arg8[%c0_13, %c0_14, %c0_15] : memref<1x1x384xf32, #tpu.memory_space<vmem>>, vector<1x1x384xf32>
    tpu.vector_store %arg8[%c0_13, %c0_14, %c0_15], %29 {strides = array<i32>} : memref<1x1x384xf32, #tpu.memory_space<vmem>>, vector<1x1x384xf32>,
    return
  }
  func.func @transform_0(%arg0: i32, %arg1: i32) -> (i32, i32) {
    %c0_i32 = arith.constant 0 : i32
    %c0_i32_0 = arith.constant 0 : i32
    %c0_i32_1 = arith.constant 0 : i32
    return %c0_i32, %c0_i32_0 : i32, i32
  }
  func.func @transform_1(%arg0: i32, %arg1: i32) -> (i32, i32) {
    %c0_i32 = arith.constant 0 : i32
    %c0_i32_0 = arith.constant 0 : i32
    %c0_i32_1 = arith.constant 0 : i32
    return %c0_i32, %c0_i32_0 : i32, i32
  }
  func.func @transform_2(%arg0: i32, %arg1: i32) -> (i32, i32) {
    %c0_i32 = arith.constant 0 : i32
    %c0_i32_0 = arith.constant 0 : i32
    %c0_i32_1 = arith.constant 0 : i32
    return %c0_i32, %c0_i32_0 : i32, i32
  }
  func.func @transform_3(%arg0: i32, %arg1: i32) -> (i32, i32) {
    %c0_i32 = arith.constant 0 : i32
    %c0_i32_0 = arith.constant 0 : i32
    %c0_i32_1 = arith.constant 0 : i32
    return %c0_i32, %c0_i32_0 : i32, i32
  }
  func.func @transform_4(%arg0: i32, %arg1: i32) -> (i32, i32, i32) {
    %c0_i32 = arith.constant 0 : i32
    %c0_i32_0 = arith.constant 0 : i32
    %c0_i32_1 = arith.constant 0 : i32
    return %arg0, %c0_i32, %c0_i32_0 : i32, i32, i32
  }
  func.func @transform_5(%arg0: i32, %arg1: i32) -> (i32, i32, i32) {
    %c0_i32 = arith.constant 0 : i32
    %c0_i32_0 = arith.constant 0 : i32
    return %arg0, %arg1, %c0_i32 : i32, i32, i32
  }
  func.func @transform_6(%arg0: i32, %arg1: i32) -> (i32, i32, i32) {
    %c1_i32 = arith.constant 1 : i32
    %0 = arith.muli %arg0, %c1_i32 : i32
    %1 = arith.addi %0, %arg1 : i32
    %c0_i32 = arith.constant 0 : i32
    %c0_i32_0 = arith.constant 0 : i32
    %c0_i32_1 = arith.constant 0 : i32
    return %1, %c0_i32, %c0_i32_0 : i32, i32, i32
  }
}

</mosaic_0001>

<bundles_post_ra>
// kernel: tpu_custom_call.1
= control target key start
LH: loop header
LB: loop body
LE: loop exit
PB: predicated region body
PF: predicated region fallthrough
CT: control target
= control target key end

     0   :  { %11 = vsyncpa [#allocation5], 0  ;;  %s1191_s0 = inlined_call_operand.vmem [shape: s32[2,1], index: 0, kind: input, shape index: {}]   ;;  %s1192_s1 = inlined_call_operand.hbm [shape: s32[1,384], index: 1, kind: input, shape index: {}]   ;;  %s1193_s2 = inlined_call_operand.hbm [shape: f32[1,384], index: 2, kind: input, shape index: {}]   ;;  %s1194_s3 = inlined_call_operand.hbm [shape: f32[1,384], index: 3, kind: input, shape index: {}]   ;;  %s1195_s4 = inlined_call_operand.vmem [shape: f32[2,1,384], index: 4, kind: input, shape index: {}]   ;;  %s1196_s5 = inlined_call_operand.hbm [shape: f32[2,1,384], index: 5, kind: input, shape index: {}]   ;;  %s1197_s6 = inlined_call_operand.hbm [shape: f32[2,1,384], index: 6, kind: output, shape index: {}]  }
   0x1   :  { %12 = vsyncpa [#allocation3], 0 }
   0x2   :  { %13 = vsyncpa [#allocation8], 0 }
   0x3   :  { %14 = vsyncpa [#allocation11], 0 }
   0x4   :  { %16 = vsyncpa [#allocation11 + $0x1], 0 }
   0x5   :  { %17 = vsyncpa [#allocation4], 0 }
   0x6   :  { %19 = vsyncpa [#allocation4 + $0x1], 0  ;;  %s1003_s21 = smov 0   ;;  %s1005_s22 = smov 0  }
   0x7   :  { %s1007_s23 = smov 0   ;;  %s1009_s24 = smov 0  }
   0x8   :  { %s1011_s25 = smov 0   ;;  %s1013_s26 = smov 0  }
   0x9 LB: > { %s242_s29 = sshll.u32 %s1193_s2, 4  ;;  %s603_s30 = sadd.s32 4294967295, %s960_s26   ;;  %s960_s26 = sphi %s1013_s26, %s25_s26   ;;  %s956_s25 = sphi %s1011_s25, %s1209_s25   ;;  %s952_s24 = sphi %s1009_s24, %s1208_s24   ;;  %s948_s23 = sphi %s1007_s23, %s1207_s23   ;;  %s944_s22 = sphi %s1005_s22, %s1206_s22   ;;  %s940_s21 = sphi %s1003_s21, %s1205_s21   ;;  %s243_s29 = int_to_ptr.hbm [resolvable:$true] %s242_s29 }
   0xa   : > { %p605_p0 = scmp.ge.s32.totalorder %s960_s26, 1  ;;  %p1040_p1 = scmp.eq.s32.totalorder %s603_s30, 0 }
   0xb   : > { %p208_p2 = scmp.lt.s32.totalorder %s960_s26, 3  ;;  %s962_s9 = smov [#allocation7]  }
   0xc   : > { %s244_s10 = sshll.u32 %s962_s9, 4  ;;  %p610_p4 = scmp.ge.s32.totalorder %s960_s26, 2  ;;  %s245_s10 = int_to_ptr.vmem [resolvable:$true] %s244_s10 }
   0xd   : > { %p1045_p3 = pnand %p605_p0, %p208_p2  ;;  %s220_s13 = sshll.u32 %s1191_s0, 4  ;;  %s221_s13 = int_to_ptr.vmem [resolvable:$true] %s220_s13 }
   0xe   : > { %s230_s17 = sshll.u32 %s1192_s1, 4  ;;  %s963_s18 = smov [#allocation2]   ;;  %s231_s17 = int_to_ptr.hbm [resolvable:$true] %s230_s17 }
   0xf   : > { %p644_p5 = pneg %p1045_p3  ;;  %s254_s27 = sshll.u32 %s1194_s3, 4  ;;  %s255_s27 = int_to_ptr.hbm [resolvable:$true] %s254_s27 }
  0x10   : > { %s964_s28 = smov [#allocation6]   ;;  %s604_s11 = sadd.s32 4294967294, %s960_s26  }
  0x11   : > { %p1057_p6 = pnand %p644_p5, %p1040_p1  ;;  %s232_s9 = sshll.u32 %s964_s28, 4  ;;  %s233_s9 = int_to_ptr.vmem [resolvable:$true] %s232_s9 }
  0x12   : > { %s37_s12 = sadd.s32 1, %s956_s25  ;;  %p163_p8 = scmp.ne.s32.totalorder %s948_s23, %s944_s22 }
  0x13   : > { %653 = dma.hbm_to_vmem [thread:$0]  (!%p1057_p6), %s243_s29, 48, %s245_s10, [#allocation8]  }
  0x14   : > { %647 = dma.vmem_to_smem (!%p1057_p6), %s221_s13, 32, %s963_s18, [#allocation5]  }
  0x15   : > { %650 = dma.hbm_to_vmem [thread:$0]  (!%p1057_p6), %s231_s17, 48, %s233_s9, [#allocation3]  }
  0x16   : > { %s965_s29 = smov [#allocation9]   ;;  %p39_p7 = scmp.ge.s32.totalorder %s37_s12, 2 }
  0x17   : > { %s256_s10 = sshll.u32 %s965_s29, 4  ;;  %s156_s13 = sadd.s32 1, %s948_s23  ;;  %s257_s10 = int_to_ptr.vmem [resolvable:$true] %s256_s10 }
  0x18   : > { %656 = dma.hbm_to_vmem [thread:$0]  (!%p1057_p6), %s255_s27, 48, %s257_s10, [#allocation8]  }
  0x19   : > { %p164_p9 = scmp.eq.s32.totalorder %s960_s26, 0  ;;  %s1211_s12 = smov (%p39_p7, %s37_s12), 0 }
  0x1a   : > { %p169_p11 = scmp.ne.s32.totalorder %s944_s22, %s940_s21  ;;  %s151_s14 = ssub.s32 %s956_s25, %s1211_s12 }
  0x1b   : > { %p1083_p10 = por %p164_p9, %p163_p8  ;;  %p195_p12 = scmp.eq.s32.totalorder %s603_s30, 1 }
  0x1c   : > { %p154_p13 = scmp.eq.s32.totalorder %s151_s14, 0  ;;  %p1095_p0 = por %p1040_p1, %p169_p11 }
  0x1d   : > { %p1099_p2 = por %p195_p12, %p163_p8  ;;  %p201_p5 = scmp.eq.s32.totalorder %s604_s11, 1 }
  0x1e   : > { %s1104_s18 = scalar_select %p154_p13, %s948_s23, %s156_s13  }
  0x1f   : > { %p1106_p6 = por %p201_p5, %p169_p11  ;;  %p669_p7 = scmp.lt.s32.totalorder %s960_s26, 2 }
  0x20   : > { %s274_s20 = sand.u32 1, %s948_s23   ;;  %s620_s30 = smul.u32 3, %s956_s25 }
  0x21   : > { %s619_s27 = smul.u32 3, %s274_s20  ;;  %p658_p8 = pnand %p669_p7, %p1083_p10 }
  0x22   : > { %s284_s29 = scalar_lea.hbm %s1196_s5, %s620_s30  ;;  %s275_s13 = scalar_lea.sflag [#allocation11], %s274_s20 }
  0x23   : > { %s286_s10 = sshll.u32 %s284_s29, 4  ;;  %s278_s14 = scalar_lea.vmem [#allocation10], %s619_s27  ;;  %s287_s10 = int_to_ptr.hbm [resolvable:$true] %s286_s10 }
  0x24   : > { %s288_s11 = sshll.u32 %s278_s14, 4  ;;  %297 = sbr.rel (%p1045_p3) target bundleno = 225 (0xe1), region = 44  ;;  %s289_s11 = int_to_ptr.vmem [resolvable:$true] %s288_s11 }
  0x25   : > { %660 = dma.hbm_to_vmem [thread:$0]  (!%p658_p8), %s287_s10, 48, %s289_s11, %s275_s13  }
  0x29   : > { %919 = dma.done.wait (%p1040_p1), [#allocation5], 32  }
  0x2a   : > { %921 = vsyncadd (%p1040_p1), [#allocation5], 4294967264 }
  0x2b   : > { %923 = dma.done.wait (%p1040_p1), [#allocation3], 48  }
  0x2c   : > { %925 = vsyncadd (%p1040_p1), [#allocation3], 4294967248 }
  0x2d   : > { %927 = dma.done.wait (%p1040_p1), [#allocation8], 96  }
  0x2e   : > { %929 = vsyncadd (%p1040_p1), [#allocation8], 4294967200  ;;  %s1133_s8 = sand.u32 1, %s944_s22  }
  0x2f   : > { %s621_s15 = smul.u32 3, %s1133_s8  ;;  %s320_s20 = scalar_lea.sflag [#allocation11], %s1133_s8 }
  0x31   : > { %s323_s30 = scalar_lea.vmem [#allocation10], %s621_s15 }
  0x32   : > { %931 = dma.done.wait (%p1095_p0), %s320_s20, 48  }
  0x33   : > { %933 = vsyncadd (%p1095_p0), %s320_s20, 4294967248 }
  0x34   : > { %329 = sfence }
  0x35   : > { %p358_p1 = scmp.lt.s32.totalorder %s952_s24, 1  ;;  %v363_v0 = vld [vmem:[%s323_s30] sm:$0x7]  ;;  %s966_s10 = smov 1   ;;  %v380_v9 = vlaneseq  ;;  %vm391_vm2 = vcmask 1040384   ;;  %vm393_vm3 = vcmask 1041408  }
  0x36   : > { %s967_s16 = smov 127   ;;  %s616_s14 = sshll.u32 %s952_s24, 7  ;;  %v437_v40 = vld [vmem:[#allocation6] sm:$0x7]  ;;  %v440_v43 = vld [vmem:[#allocation7] sm:$0x7] }
  0x37   : > { %s359_s7 = scalar_select %p358_p1, %s952_s24, 1  ;;  %v381_v11 = vand.u32 127, %v380_v9  ;;  %v429_v31 = vshrl.u32 %v380_v9, 7  ;;  %v441_v44 = vld [vmem:[#allocation9] sm:$0x7]  ;;  %vm447_vm7 = vcmp.lt.s32.totalorder %v380_v9, 384 }
  0x38   : > { %s431_s11 = sld [smem:[#allocation2 + %s616_s14]]  ;;  %s623_s13 = smul.u32 3, %s952_s24 }
  0x39   : > { %s622_s27 = smul.u32 3, %s359_s7  ;;  %vm403_vm0 = vcmp.lt.s32.totalorder %v381_v11, 127  ;;  %vm382_vm1 = vcmp.lt.s32.totalorder %v381_v11, 1  ;;  %v434_v32 = vmul.u32 384, %v429_v31  ;;  %s451_s9 = scalar_lea.sflag [#allocation4], %s1133_s8 }
  0x3a   : > { %s462_s7 = scalar_lea.hbm %s1197_s6, %s623_s13  ;;  %s886_s14 = scalar_lea.hbm %s1197_s6, 6 }
  0x3b   : > { %s361_s29 = scalar_lea.vmem %s1195_s4, %s622_s27  ;;  %s357_s27 = scalar_lea.vmem [#allocation12], %s621_s15 }
  0x3c   : > { %v364_v1 = vld [vmem:[%s361_s29] sm:$0x7]  ;;  %s464_s28 = sshll.u32 %s357_s27, 4  ;;  %s466_s24 = sshll.u32 %s462_s7, 4  ;;  %s465_s28 = int_to_ptr.vmem [resolvable:$true] %s464_s28  ;;  %s467_s24 = int_to_ptr.hbm [resolvable:$true] %s466_s24 }
  0x3d   : > { %v365_v2 = vsub.f32 %v363_v0, %v364_v1  ;;  %s880_s29 = sshra.s32 %s467_s24, 4  ;;  %s881_s29 = int_to_ptr.hbm [resolvable:$true] %s880_s29 }
  0x3e   : > { %v435_v33 = vstv %s431_s11  ;;  %p887_p11 = scmp.lt.s32.totalorder %s881_s29, %s1197_s6 }
  0x3f   : > { %v366_v3 = vmul.f32 %v365_v2, %v365_v2  ;;  %v436_v36 = vsub.s32 %v435_v33, %v434_v32 }
  0x41   : > { %v370_v4 = vperm.slane %v366_v3, 2  ;;  %v368_v5 = vperm.slane %v366_v3, 0  ;;  %v369_v6 = vperm.slane %v366_v3, 1  ;;  %v438_v39 = vperm.slane %v436_v36, 0 }
  0x43   : > { %378 = vrot.lane.b32.xlu1 %v370_v4, %s966_s10  ;;  %374 = vrot.lane.b32.xlu0 %v368_v5, %s966_s10  ;;  %vm439_vm4 = vcmp.lt.s32.totalorder %v437_v40, %v438_v39 }
  0x44   : > { %401 = vrot.lane.b32.xlu2 %v370_v4, %s967_s16  ;;  %v442_v47 = vsel %vm439_vm4, %v440_v43, %v441_v44 }
  0x4b   : > { %399 = vrot.lane.b32.xlu1 %v369_v6, %s967_s16  ;;  %376 = vrot.lane.b32.xlu0 %v369_v6, %s966_s10  ;;  %s882_s10 = scalar_lea.hbm %s881_s29, 3 }
  0x4c   : > { %397 = vrot.lane.b32.xlu2 %v368_v5, %s967_s16  ;;  %p883_p3 = scmp.ne.s32.totalorder %s881_s29, %s882_s10  ;;  %p888_p12 = scmp.lt.s32.totalorder %s886_s14, %s882_s10 }
  0x4e   : > { %p884_p9 = pnand %p883_p3, %p1099_p2  ;;  %p889_p13 = por %p888_p12, %p887_p11 }
  0x50   : > { %p885_p10 = pneg %p884_p9 }
  0x52   : > { %p890_p0 = pnand %p889_p13, %p885_p10 }
  0x9e   : > { %v402_v7 = vpop.permute.xlu2 %401 }
  0xa6   : > { %v398_v12 = vpop.permute.xlu2 %397 }
  0xa7   : > { %v406_v19 = vsel %vm403_vm0, %v402_v7, %v398_v12 }
  0xa8   : > { %v411_v26 = vrot.slane %v406_v19, 6 }
  0xb5   : > { %v379_v8 = vpop.permute.xlu1 %378  ;;  %v375_v10 = vpop.permute.xlu0 %374 }
  0xb6   : > { %v385_v23 = vsel %vm382_vm1, %v379_v8, %v375_v10 }
  0xbd   : > { %v400_v13 = vpop.permute.xlu1 %399  ;;  %v377_v14 = vpop.permute.xlu0 %376 }
  0xbe   : > { %v404_v15 = vsel %vm403_vm0, %v400_v13, %v402_v7  ;;  %v405_v16 = vsel %vm403_vm0, %v398_v12, %v400_v13  ;;  %v383_v17 = vsel %vm382_vm1, %v377_v14, %v379_v8  ;;  %v384_v18 = vsel %vm382_vm1, %v375_v10, %v377_v14 }
  0xbf   : > { %v410_v20 = vrot.slane %v404_v15, 7  ;;  %v389_v21 = vrot.slane %v384_v18, 7  ;;  %v390_v22 = vrot.slane %v383_v17, 6 }
  0xc1   : > { %v412_v24 = vsel %vm391_vm2, %v405_v16, %v410_v20  ;;  %v392_v25 = vsel %vm391_vm2, %v385_v23, %v389_v21 }
  0xc2   : > { %v394_v27 = vsel %vm393_vm3, %v392_v25, %v390_v22  ;;  %v413_v29 = vsel %vm393_vm3, %v412_v24, %v411_v26 }
  0xc3   : > { %v396_v28 = vadd.f32 %v394_v27, %v366_v3 }
  0xc5   : > { %v415_v30 = vadd.f32 %v413_v29, %v396_v28 }
  0xc7   : > { %729 = vrsqrt.f32 %v415_v30  ;;  %vm423_vm5 = vcmp.eq.f32.partialorder %v415_v30, inf  ;;  %v426_v46 = vand.u32 2147483648, %v415_v30  ;;  %vm425_vm6 = vcmp.eq.f32.partialorder %v415_v30, 0.0 }
  0xcd   : > { %v730_v34 = vpop.eup %729 }
  0xce   : > { %v417_v35 = vmul.f32 %v730_v34, %v415_v30 }
  0xd0   : > { %v418_v37 = vmul.f32 %v730_v34, %v417_v35 }
  0xd2   : > { %v419_v38 = vmul.f32 0.5, %v418_v37 }
  0xd4   : > { %v420_v41 = vsub.f32 1.5, %v419_v38 }
  0xd6   : > { %v421_v42 = vmul.f32 %v730_v34, %v420_v41 }
  0xd8   : > { %v422_v45 = vmul.f32 %v421_v42, %v415_v30 }
  0xda   : > { %v424_v48 = vsel %vm423_vm5, %v415_v30, %v422_v45 }
  0xdb   : > { %v427_v49 = vsel %vm425_vm6, %v426_v46, %v424_v48 }
  0xdc   : > { %v443_v50 = vmul.f32 %v442_v47, %v427_v49 }
  0xde   : > { %449 = vst.msk [vmem:[%s357_s27] sm:$0x7] %vm447_vm7, %v443_v50 }
  0xdf   : > { %893 = shalt.err (!%p890_p0)
}
  0xe0   : > { %642 = dma.vmem_to_hbm [thread:$0]  (%p1099_p2), %s465_s28, 48, %s467_s24, %s451_s9  }
  0xe1 PF: > { %s478_s8 = sand.u32 1, %s940_s21   ;;  %p662_p5 = pnand %p610_p4, %p1106_p6 }
  0xe2   : > { %s479_s20 = scalar_lea.sflag [#allocation4], %s478_s8 }
  0xe3   : > { %p663_p7 = pneg %p662_p5 }
  0xe5   : > { %935 = dma.done.wait (%p663_p7), %s479_s20, 48  }
  0xe6   : > { %937 = vsyncadd (%p663_p7), %s479_s20, 4294967248  ;;  %s25_s26 = sadd.s32 1, %s960_s26   ;;  %s1205_s21 = smov %s944_s22 }
  0xe7   : > { %p22_p8 = scmp.ge.s32.totalorder %s25_s26, 4   ;;  %s1206_s22 = smov %s948_s23 }
  0xe8   : > { %s1207_s23 = smov %s1104_s18  ;;  %s1208_s24 = smov %s956_s25 }
  0xe9   : > { %s1209_s25 = smov %s1211_s12  ;;  %24 = sbr.rel (!%p22_p8) target bundleno = 9 (0x9), region = 110 }
  0xee   :  { %485 = vsyncpa [#allocation3], 1 }
  0xef   :  { %487 = vsyncpa [#allocation3 + $0x1], 1 }
  0xf0   :  { %488 = vsyncpa [#allocation8], 1 }
  0xf1   :  { %489 = vsyncpa [#allocation11], 1 }
  0xf2   :  { %491 = vsyncpa [#allocation11 + $0x1], 1 }
  0xf3   :  { %492 = vsyncpa [#allocation4], 1 }
  0xf4   :  { %494 = vsyncpa [#allocation4 + $0x1], 1 }
  0xf5   :  { %495 = vsyncpa [#allocation5], 1 }
  0xf6   :  { %497 = vsyncpa [#allocation5 + $0x1], 1 }

</bundles_post_ra>
